<compile_context>
chip_gen: v7x
topology: tpu7x:2x2x1
jax: 0.10.0
libtpu: 0.0.40
codegen_flags: <defaults>
</compile_context>

<pallas_src>
import functools

import jax
import jax.numpy as jnp
from jax.experimental import pallas as pl
from jax.experimental.pallas import tpu as pltpu


def _round_up(n, m):
    return (n + m - 1) // m * m


def _linear_kernel(x_ref, w_ref, b_ref, o_ref, *, use_dot):
    x = x_ref[...]                                        # (TM, Kx) f32
    if use_dot:
        # w_ref: (Kx, Ny) resident in VMEM; contraction over x's lane dim (MXU).
        y = jnp.dot(x, w_ref[...], preferred_element_type=jnp.float32)
    else:
        # Ny == 1: broadcast multiply (VPU) + lane reduce (XLU); no 1-wide MXU op.
        # w_ref: (1, Kx) torch-layout weight row.
        y = jnp.sum(x * w_ref[...], axis=-1, keepdims=True)
    o_ref[...] = (y + b_ref[...]).astype(o_ref.dtype)     # b_ref: (1, Ny)


# Per-buffer byte budget for the streamed x tile.  BlockSpec double-buffers it
# (x2), so steady-state is ~16 MiB + tiny resident weight/bias/output blocks:
# comfortably inside v7x's 64 MiB per-TC VMEM, and inside the raised scoped
# limit below on v5e / v6e (128 MiB physical).
_X_TILE_BYTES = 8 * 1024 * 1024
_VMEM_LIMIT_BYTES = 48 * 1024 * 1024


def logistic_regression_forward(x, params, *, tm=None):
    """x: (B, K) float32.  params: torch-layout {"w": (N, K), "b": (N,)}."""
    B, K = x.shape
    w = params["w"].astype(jnp.float32)
    b = params["b"].astype(jnp.float32)
    assert w.ndim == 2 and w.shape[1] == K, f"weight shape {w.shape} vs K={K}"
    N = w.shape[0]
    assert b.shape == (N,), f"bias shape {b.shape} != ({N},)"
    x = x.astype(jnp.float32)

    # ---- layout selection ------------------------------------------------
    r = 128 // K if (N == 1 and K < 128 and 128 % K == 0) else 1
    fold = r > 1 and B % r == 0 and B >= r
    if fold:
        # Fold r batch rows into the lane dim (free row-major merge) and use a
        # block-diagonal weight so every output column is one original row.
        brows, kx, ny = B // r, r * K, r
        x_in = x.reshape(brows, kx)
        eye = jnp.eye(r, dtype=jnp.float32)                       # (r, r)
        w_mat = (eye[:, None, :] * w.reshape(1, K, 1)).reshape(kx, ny)
        b_row = jnp.broadcast_to(b.reshape(1, 1), (1, ny))
        use_dot = True
    elif N == 1:
        brows, kx, ny = B, K, 1
        x_in = x
        w_mat = w                                                 # (1, K), as-is
        b_row = b.reshape(1, 1)
        use_dot = False
    else:
        brows, kx, ny = B, K, N
        x_in = x
        w_mat = w.T                                               # tiny one-time (K, N)
        b_row = b.reshape(1, N)
        use_dot = True

    # ---- tile sizing (bytes, lane-padding and double-buffering aware) ----
    lane_k = _round_up(kx, 128)
    rows_budget = max(8, (_X_TILE_BYTES // (4 * lane_k)) // 8 * 8)
    TM = rows_budget if tm is None else max(8, _round_up(min(tm, rows_budget), 8))
    # Keep >= 4 grid steps for large batches so the ("parallel",) batch axis
    # can shard across both TensorCores on v7x.
    if pl.cdiv(brows, 4) >= 8:
        TM = min(TM, _round_up(pl.cdiv(brows, 4), 8))
    TM = max(8, min(TM, _round_up(brows, 8)))

    # Ragged last block: OOB input rows read unspecified data (rows are
    # independent, no cross-row reduction) and OOB output writes are dropped.
    grid = (pl.cdiv(brows, TM),)

    kernel = functools.partial(_linear_kernel, use_dot=use_dot)
    w_block = (kx, ny) if use_dot else (1, kx)
    out = pl.pallas_call(
        kernel,
        out_shape=jax.ShapeDtypeStruct((brows, ny), jnp.float32),
        grid=grid,
        in_specs=[
            pl.BlockSpec((TM, kx), lambda i: (i, 0)),             # streamed batch tile
            pl.BlockSpec(w_block, lambda i: (0, 0)),              # resident weight
            pl.BlockSpec((1, ny), lambda i: (0, 0)),              # resident bias row
        ],
        out_specs=pl.BlockSpec((TM, ny), lambda i: (i, 0)),
        compiler_params=pltpu.CompilerParams(
            dimension_semantics=("parallel",),
            vmem_limit_bytes=_VMEM_LIMIT_BYTES,
        ),
    )(x_in, w_mat, b_row)

    if fold:
        out = out.reshape(B, 1)                                   # free un-fold
    return out


def init_params(key, input_size, output_size=1):
    """torch nn.Linear init convention: weight (out, in), bias (out,)."""
    kw, kb = jax.random.split(key)
    bound = 1.0 / (input_size ** 0.5)
    w = jax.random.uniform(kw, (output_size, input_size), jnp.float32, -bound, bound)
    b = jax.random.uniform(kb, (output_size,), jnp.float32, -bound, bound)
    return {"w": w, "b": b}


if __name__ == "__main__":
    key = jax.random.PRNGKey(0)
    k_x, k_p, k_x2, k_x3, k_p3 = jax.random.split(key, 5)

    # 1) Default LogisticRegression case: output_size=1, K=32 -> lane-folded path.
    batch, input_size = 8, 32
    x = jax.random.normal(k_x, (batch, input_size), jnp.float32)
    params = init_params(k_p, input_size)
    out = jax.block_until_ready(logistic_regression_forward(x, params))
    ref = x @ params["w"].T + params["b"]
    assert out.shape == (batch, 1)
    assert jnp.allclose(out, ref, atol=1e-5, rtol=1e-5)

    # 2) Batch not divisible by the fold factor -> VPU multiply+reduce path.
    x2 = jax.random.normal(k_x2, (7, input_size), jnp.float32)
    out2 = jax.block_until_ready(logistic_regression_forward(x2, params))
    ref2 = x2 @ params["w"].T + params["b"]
    assert out2.shape == (7, 1)
    assert jnp.allclose(out2, ref2, atol=1e-5, rtol=1e-5)

    # 3) output_size > 1 -> general resident-weight MXU path.
    params3 = init_params(k_p3, input_size, output_size=3)
    x3 = jax.random.normal(k_x3, (16, input_size), jnp.float32)
    out3 = jax.block_until_ready(logistic_regression_forward(x3, params3))
    ref3 = x3 @ params3["w"].T + params3["b"]
    assert out3.shape == (16, 3)
    assert jnp.allclose(out3, ref3, atol=1e-5, rtol=1e-5)

    print("KERNEL_OK")
</pallas_src>

<mosaic_0001>
module attributes {stable_mosaic.version = 11 : i64} {
  func.func @_linear_kernel(%arg0: i32, %arg1: memref<8x128xf32, #tpu.memory_space<vmem>>, %arg2: memref<128x4xf32, #tpu.memory_space<vmem>>, %arg3: memref<1x4xf32, #tpu.memory_space<vmem>>, %arg4: memref<8x4xf32, #tpu.memory_space<vmem>>) attributes {dimension_semantics = [#tpu.dimension_semantics<parallel>], iteration_bounds = array<i64: 1>, scalar_prefetch = 0 : i64, scratch_operands = 0 : i64, tpu.core_type = #tpu.core_type<tc>, window_params = [{transform_indices = @transform_0, window_bounds = array<i64: 8, 128>}, {pipeline_mode = #tpu.pipeline_mode<synchronous>, transform_indices = @transform_1, window_bounds = array<i64: 128, 4>}, {pipeline_mode = #tpu.pipeline_mode<synchronous>, transform_indices = @transform_2, window_bounds = array<i64: 1, 4>}, {transform_indices = @transform_3, window_bounds = array<i64: 8, 4>}]} {
    %c0 = arith.constant 0 : index
    %c0_0 = arith.constant 0 : index
    %0 = vector.load %arg1[%c0, %c0_0] : memref<8x128xf32, #tpu.memory_space<vmem>>, vector<8x128xf32>
    %c0_1 = arith.constant 0 : index
    %c0_2 = arith.constant 0 : index
    %1 = vector.load %arg2[%c0_1, %c0_2] : memref<128x4xf32, #tpu.memory_space<vmem>>, vector<128x4xf32>
    %cst = arith.constant dense<0.000000e+00> : vector<8x4xf32>
    %2 = tpu.matmul %0, %1, %cst {dimension_numbers = #tpu.dot_dimension_numbers<[1], [0], [0], [1], [0, 0, 1, 1], [], []>} : vector<8x128xf32>, vector<128x4xf32>, vector<8x4xf32> -> vector<8x4xf32>
    %c0_3 = arith.constant 0 : index
    %c0_4 = arith.constant 0 : index
    %3 = vector.load %arg3[%c0_3, %c0_4] : memref<1x4xf32, #tpu.memory_space<vmem>>, vector<1x4xf32>
    %4 = vector.broadcast %3 : vector<1x4xf32> to vector<8x4xf32>
    %5 = arith.addf %2, %4 : vector<8x4xf32>
    %c0_5 = arith.constant 0 : index
    %c0_6 = arith.constant 0 : index
    %6 = vector.load %arg4[%c0_5, %c0_6] : memref<8x4xf32, #tpu.memory_space<vmem>>, vector<8x4xf32>
    tpu.vector_store %arg4[%c0_5, %c0_6], %5 {strides = array<i32>} : memref<8x4xf32, #tpu.memory_space<vmem>>, vector<8x4xf32>,
    return
  }
  func.func @transform_0(%arg0: i32) -> (i32, i32) {
    %c0_i32 = arith.constant 0 : i32
    %c0_i32_0 = arith.constant 0 : i32
    return %arg0, %c0_i32 : i32, i32
  }
  func.func @transform_1(%arg0: i32) -> (i32, i32) {
    %c0_i32 = arith.constant 0 : i32
    %c0_i32_0 = arith.constant 0 : i32
    %c0_i32_1 = arith.constant 0 : i32
    return %c0_i32, %c0_i32_0 : i32, i32
  }
  func.func @transform_2(%arg0: i32) -> (i32, i32) {
    %c0_i32 = arith.constant 0 : i32
    %c0_i32_0 = arith.constant 0 : i32
    %c0_i32_1 = arith.constant 0 : i32
    return %c0_i32, %c0_i32_0 : i32, i32
  }
  func.func @transform_3(%arg0: i32) -> (i32, i32) {
    %c0_i32 = arith.constant 0 : i32
    %c0_i32_0 = arith.constant 0 : i32
    return %arg0, %c0_i32 : i32, i32
  }
}

</mosaic_0001>

<bundles_post_ra>
// kernel: tpu_custom_call.1
= control target key start
LH: loop header
LB: loop body
LE: loop exit
PB: predicated region body
PF: predicated region fallthrough
CT: control target
= control target key end

     0   :  { %8 = vsyncpa [#allocation3], 0  ;;  %v234_v2 = vmov 0.0|0.0   ;;  %vm235_vm0 = vmmov 0   ;;  %v236_v6 = vmov 0.0   ;;  %vm109_vm1 = vcmask 31744   ;;  %s326_s0 = inlined_call_operand.vmem [shape: f32[2,128], index: 0, kind: input, shape index: {}]   ;;  %s327_s1 = inlined_call_operand.vmem [shape: f32[128,4], index: 1, kind: input, shape index: {}]   ;;  %s328_s2 = inlined_call_operand.vmem [shape: f32[1,4], index: 2, kind: input, shape index: {}]   ;;  %s329_s3 = inlined_call_operand.hbm [shape: f32[2,4], index: 3, kind: output, shape index: {}]  }
   0x1   :  { %v16_v0 = vld [vmem:[%s327_s1] sm:$0xff]  ;;  %v17_v1 = vld [vmem:[%s327_s1 + $0x8] sm:$0xff]  ;;  %180 = vmatprep.subr.bf16.mxu0 %v234_v2  ;;  %v18_v4 = vld [vmem:[%s327_s1 + $0x10] sm:$0xff]  ;;  %177 = vmatprep.mubr.msk.f32.mxu0 %vm235_vm0, %v236_v6 }
   0x2   :  { %v181_v3 = vpack.c.bf16 %v17_v1, %v16_v0  ;;  %v19_v5 = vld [vmem:[%s327_s1 + $0x18] sm:$0xff]  ;;  %v20_v8 = vld [vmem:[%s327_s1 + $0x20] sm:$0xff]  ;;  %v21_v9 = vld [vmem:[%s327_s1 + $0x28] sm:$0xff] }
   0x3   :  { %v184_v7 = vpack.c.bf16 %v19_v5, %v18_v4  ;;  %v187_v10 = vpack.c.bf16 %v21_v9, %v20_v8  ;;  %v22_v11 = vld [vmem:[%s327_s1 + $0x30] sm:$0xff]  ;;  %v23_v12 = vld [vmem:[%s327_s1 + $0x38] sm:$0xff]  ;;  %v24_v14 = vld [vmem:[%s327_s1 + $0x40] sm:$0xff] }
   0x4   :  { %182 = vmatpush3.bf16.msra.mxu0 %v181_v3  ;;  %v190_v13 = vpack.c.bf16 %v23_v12, %v22_v11  ;;  %v25_v15 = vld [vmem:[%s327_s1 + $0x48] sm:$0xff]  ;;  %v26_v17 = vld [vmem:[%s327_s1 + $0x50] sm:$0xff]  ;;  %v27_v18 = vld [vmem:[%s327_s1 + $0x58] sm:$0xff] }
   0x5   :  { %183 = vmatprep.subr.bf16.mxu0 %v234_v2  ;;  %v193_v16 = vpack.c.bf16 %v25_v15, %v24_v14  ;;  %v196_v19 = vpack.c.bf16 %v27_v18, %v26_v17  ;;  %v28_v20 = vld [vmem:[%s327_s1 + $0x60] sm:$0xff]  ;;  %v29_v21 = vld [vmem:[%s327_s1 + $0x68] sm:$0xff]  ;;  %v30_v23 = vld [vmem:[%s327_s1 + $0x70] sm:$0xff] }
   0x6   :  { %v199_v22 = vpack.c.bf16 %v29_v21, %v28_v20  ;;  %v31_v24 = vld [vmem:[%s327_s1 + $0x78] sm:$0xff]  ;;  %v15_v26 = vld [vmem:[%s326_s0] sm:$0xff] }
   0x7   :  { %v202_v25 = vpack.c.bf16 %v31_v24, %v30_v23  ;;  %v127_v27 = vld [vmem:[%s328_s2] ss:$0 sm:$0xff] }
   0x8   :  { %185 = vmatpush3.bf16.msra.mxu0 %v184_v7 }
   0x9   :  { %186 = vmatprep.subr.bf16.mxu0 %v234_v2 }
   0xc   :  { %188 = vmatpush3.bf16.msra.mxu0 %v187_v10 }
   0xd   :  { %189 = vmatprep.subr.bf16.mxu0 %v234_v2 }
  0x10   :  { %191 = vmatpush3.bf16.msra.mxu0 %v190_v13 }
  0x11   :  { %192 = vmatprep.subr.bf16.mxu0 %v234_v2 }
  0x14   :  { %194 = vmatpush3.bf16.msra.mxu0 %v193_v16 }
  0x15   :  { %195 = vmatprep.subr.bf16.mxu0 %v234_v2 }
  0x18   :  { %197 = vmatpush3.bf16.msra.mxu0 %v196_v19 }
  0x19   :  { %198 = vmatprep.subr.bf16.mxu0 %v234_v2 }
  0x1c   :  { %200 = vmatpush3.bf16.msra.mxu0 %v199_v22 }
  0x1d   :  { %201 = vmatprep.subr.bf16.mxu0 %v234_v2 }
  0x20   :  { %203 = vmatpush3.bf16.msra.mxu0 %v202_v25 }
  0x23   :  { %178 = vmatmul.mubr.f32.vlgmr.msra.gmra.mrb[0].mxu0 %v15_v26 }
  0xf6   :  { %v105_v28 = vpop.f32.mrb[0].mxu0 }
  0xf7   :  { %v106_v29 = vadd.f32 %v127_v27, %v105_v28  ;;  %v179_v30 = vpop.f32.mrb[1].mxu0 }
  0xf9   :  { %110 = vst.msk [vmem:[#allocation2] sm:$0xff] %vm109_vm1, %v106_v29 }
  0xfa   :  { %115 = vsyncadd [#allocation3], 96  ;;  %s237_s1 = smov [#allocation2]  }
  0xfb   :  { %s116_s21 = sshll.u32 %s237_s1, 4  ;;  %s117_s21 = int_to_ptr.vmem [resolvable:$true] %s116_s21 }
  0xfc   :  { %s210_s22 = scalar_lea.vmem %s117_s21, 32  ;;  %s214_s23 = scalar_lea.vmem %s117_s21, 128 }
  0xfd   :  { %p211_p0 = scmp.ne.s32.totalorder %s117_s21, %s210_s22  ;;  %p215_p1 = scmp.lt.s32.totalorder %s117_s21, %s117_s21 }
  0xfe   :  { %p216_p2 = scmp.lt.s32.totalorder %s214_s23, %s210_s22 }
 0x100   :  { %p217_p3 = por %p216_p2, %p215_p1 }
 0x102   :  { %p218_p4 = pnand %p217_p3, %p211_p0 }
 0x104   :  { %221 = shalt.err (!%p218_p4)
}
 0x105   :  { %s222_s2 = scalar_lea.hbm %s329_s3, 32 }
 0x106   :  { %p223_p5 = scmp.ne.s32.totalorder %s329_s3, %s222_s2  ;;  %p226_p6 = scmp.lt.u32.totalorder %s222_s2, %s329_s3 }
 0x108   :  { %p228_p7 = pnand %p226_p6, %p223_p5 }
 0x10a   :  { %231 = shalt.err (!%p228_p7)
}
 0x10b   :  { %s238_s29 = smov 32   ;;  %s239_s30 = smov 2  }
 0x10c   :  { %122 = dma.vmem_to_hbm [thread:$0]  %s117_s21, 32, %s329_s3, [#allocation3], %s238_s29, %s238_s29, %s239_s30  }
 0x10d   :  { %232 = dma.done.wait [#allocation3], 128  }
 0x10e   :  { %233 = vsyncadd [#allocation3], 4294967168 }
 0x10f   :  { %126 = vsyncpa [#allocation3], 1 }

</bundles_post_ra>
